<compile_context>
chip_gen: v6e
topology: v6e:2x2x1
jax: 0.10.0
libtpu: 0.0.40
codegen_flags: <defaults>
</compile_context>

<pallas_src>
import functools

import jax
import jax.numpy as jnp
from jax.experimental import pallas as pl
from jax.experimental.pallas import tpu as pltpu


_VMEM_CONFIG_CACHE = None


def _vmem_config():
    """(working_budget_bytes, vmem_limit_bytes), sized per TPU generation."""
    global _VMEM_CONFIG_CACHE
    if _VMEM_CONFIG_CACHE is not None:
        return _VMEM_CONFIG_CACHE
    try:
        cap = int(getattr(pltpu.get_tpu_info(), "vmem_capacity_bytes", 0))
    except Exception:
        cap = 0
    if cap >= 100 * 1024 * 1024:          # v5e / v6e: 128 MiB physical VMEM
        cfg = (40 * 1024 * 1024, 64 * 1024 * 1024)
    else:                                  # v7x (64 MiB physical) or unknown: conservative
        cfg = (16 * 1024 * 1024, 32 * 1024 * 1024)
    _VMEM_CONFIG_CACHE = cfg
    return cfg


def _choose_tiles(n, c, hw, itemsize, lab_itemsize, vmem_budget,
                  max_tile_hw=None, max_tile_n=None):
    """Pick (tile_n, tile_hw): lane tile sized from the VMEM budget; images are
    batched into one block (tile_n > 1) only when a full image fits in one tile."""
    c_pad = -(-c // 8) * 8                     # sublane padding of the class axis

    def bytes_per_lane(tile_n):
        return (tile_n * (2 * c_pad * itemsize     # double-buffered logits block
                          + 2 * 8 * lab_itemsize   # double-buffered labels (8-sublane pad)
                          + 6 * c_pad * 4)         # headroom for f32/i32 (C,T) temporaries
                + 2 * 8 * 4)                       # two f32 (1, T) accumulators

    t = (vmem_budget // bytes_per_lane(1)) // 128 * 128
    t = max(t, 128)
    if max_tile_hw is not None:
        t = max(128, min(t, max_tile_hw // 128 * 128))
    if hw > t:
        return 1, t                                # multiple lane tiles per image

    tile_hw = hw                                   # full image along HW (full-dim block is legal)
    # Small image: pack several images per block, targeting >= ~2 MiB of logits per step.
    target_bytes = 2 * 1024 * 1024
    tile_n = 1
    cap_n = n if max_tile_n is None else min(n, max_tile_n)
    while (tile_n < cap_n
           and bytes_per_lane(tile_n + 1) * tile_hw <= vmem_budget
           and tile_n * c_pad * tile_hw * itemsize < target_bytes):
        tile_n += 1
    return tile_n, tile_hw


def _ce_kernel(x_ref, y_ref, w_ref, num_ref, den_ref, acc_num, acc_den, *,
               hw, n_total, tile_n, tile_hw, ragged_hw, ragged_n):
    # x_ref:   (tile_n, C, tile_hw) logits block (classes on sublanes, pixels on lanes)
    # y_ref:   (tile_n, 1, tile_hw) integer labels (int16/int32)
    # w_ref:   (1, C, 1) f32 class weights
    # num/den: (1, 1) f32 per-N-block partial sums (resident across the t axis)
    # acc_*:   (1, tile_hw) f32 lane-dense accumulators (scratch, reset per N block)
    t = pl.program_id(1)

    @pl.when(t == 0)
    def _():
        acc_num[...] = jnp.zeros_like(acc_num)
        acc_den[...] = jnp.zeros_like(acc_den)

    x = x_ref[...].astype(jnp.float32)               # (tile_n, C, T)
    y = y_ref[...].astype(jnp.int32)                 # (tile_n, 1, T)
    w = w_ref[...].astype(jnp.float32)               # (1, C, 1)

    # Numerically stable log-sum-exp over the class (sublane) axis, per pixel (lane).
    mx = jnp.max(x, axis=1, keepdims=True)                                   # (tile_n, 1, T)
    lse = mx + jnp.log(jnp.sum(jnp.exp(x - mx), axis=1, keepdims=True))      # (tile_n, 1, T)

    # One-hot gathers of x[y] and w[y]; combine at (1, T) width. Labels outside
    # [0, C) hit no class -> 0 contribution to both sums (ignore semantics).
    cls = jax.lax.broadcasted_iota(jnp.int32, x.shape, 1)                    # (tile_n, C, T)
    onehot = cls == y
    x_y = jnp.sum(jnp.where(onehot, x, 0.0), axis=1, keepdims=True)          # (tile_n, 1, T)
    w_y = jnp.sum(jnp.where(onehot, w, 0.0), axis=1, keepdims=True)          # (tile_n, 1, T)

    contrib_num = w_y * (lse - x_y)                                          # (tile_n, 1, T)
    contrib_den = w_y

    # Ragged-edge masks only when the tiling actually needs them (static flags).
    masks = []
    if ragged_hw:
        lane = jax.lax.broadcasted_iota(jnp.int32, (tile_n, 1, tile_hw), 2)
        masks.append(t * tile_hw + lane < hw)
    if ragged_n:
        row = jax.lax.broadcasted_iota(jnp.int32, (tile_n, 1, tile_hw), 0)
        masks.append(pl.program_id(0) * tile_n + row < n_total)
    if masks:
        valid = masks[0]
        for extra in masks[1:]:
            valid = valid & extra
        contrib_num = jnp.where(valid, contrib_num, 0.0)
        contrib_den = jnp.where(valid, contrib_den, 0.0)

    # Lane-dense accumulation; the leading-axis sum is a handful of VPU adds.
    acc_num[...] += jnp.sum(contrib_num, axis=0)                             # (1, T)
    acc_den[...] += jnp.sum(contrib_den, axis=0)                             # (1, T)

    # Single cross-lane collapse per N block; output stays resident across t.
    @pl.when(t == pl.num_programs(1) - 1)
    def _():
        num_ref[...] = jnp.sum(acc_num[...], axis=1, keepdims=True)
        den_ref[...] = jnp.sum(acc_den[...], axis=1, keepdims=True)


@functools.partial(jax.jit, static_argnames=("tile_n", "tile_hw"))
def _ce_sums(logits, labels, weights_f32, tile_n, tile_hw):
    N, C, H, W = logits.shape
    HW = H * W
    x3 = logits.reshape(N, C, HW)                    # free reshape, no transpose
    lab_dtype = jnp.int16 if C <= 32767 else jnp.int32
    y3 = labels.reshape(N, 1, HW).astype(lab_dtype)  # narrow label traffic
    w3 = weights_f32.reshape(1, C, 1)

    NB = pl.cdiv(N, tile_n)
    T = pl.cdiv(HW, tile_hw)
    ragged_hw = (HW % tile_hw) != 0
    ragged_n = (N % tile_n) != 0
    _, vmem_limit = _vmem_config()

    kernel = functools.partial(
        _ce_kernel, hw=HW, n_total=N, tile_n=tile_n, tile_hw=tile_hw,
        ragged_hw=ragged_hw, ragged_n=ragged_n)

    num_p, den_p = pl.pallas_call(
        kernel,
        out_shape=(
            jax.ShapeDtypeStruct((NB, 1), jnp.float32),
            jax.ShapeDtypeStruct((NB, 1), jnp.float32),
        ),
        grid_spec=pltpu.PrefetchScalarGridSpec(
            num_scalar_prefetch=0,
            grid=(NB, T),
            in_specs=[
                pl.BlockSpec((tile_n, C, tile_hw), lambda nb, t: (nb, 0, t)),
                pl.BlockSpec((tile_n, 1, tile_hw), lambda nb, t: (nb, 0, t)),
                pl.BlockSpec((1, C, 1), lambda nb, t: (0, 0, 0)),
            ],
            out_specs=[
                pl.BlockSpec((1, 1), lambda nb, t: (nb, 0)),
                pl.BlockSpec((1, 1), lambda nb, t: (nb, 0)),
            ],
            scratch_shapes=[
                pltpu.VMEM((1, tile_hw), jnp.float32),
                pltpu.VMEM((1, tile_hw), jnp.float32),
            ],
        ),
        compiler_params=pltpu.CompilerParams(
            dimension_semantics=("parallel", "arbitrary"),
            vmem_limit_bytes=vmem_limit,
        ),
    )(x3, y3, w3)
    # Tiny (NB, 1) partials: collapse in plain XLA.
    return jnp.sum(num_p), jnp.sum(den_p)


def cross_entropy_loss_2d(logits, labels, weights=None, max_tile_hw=None, max_tile_n=None):
    """Weighted 2D cross-entropy, matching F.cross_entropy(logits, labels, weights).

    logits: (N, C, H, W) float (f32 or bf16), labels: (N, H, W) int,
    weights: (C,) float or None.
    """
    N, C, H, W = logits.shape
    w = (jnp.ones((C,), jnp.float32) if weights is None
         else jnp.asarray(weights, jnp.float32))
    lab_itemsize = 2 if C <= 32767 else 4
    budget, _ = _vmem_config()
    tile_n, tile_hw = _choose_tiles(
        N, C, H * W, jnp.dtype(logits.dtype).itemsize, lab_itemsize, budget,
        max_tile_hw=max_tile_hw, max_tile_n=max_tile_n)
    num, den = _ce_sums(logits, labels, w, tile_n, tile_hw)
    # PyTorch returns the loss in the logits dtype; den == 0 -> NaN (same as PyTorch).
    return (num / den).astype(logits.dtype)


def _reference(logits, labels, weights):
    # Plain-JAX reference of weighted mean cross-entropy.
    x = jnp.transpose(logits, (0, 2, 3, 1)).reshape(-1, logits.shape[1]).astype(jnp.float32)
    y = labels.reshape(-1)
    logp = jax.nn.log_softmax(x, axis=-1)
    nll = -jnp.take_along_axis(logp, y[:, None], axis=-1)[:, 0]
    w = (jnp.ones((logits.shape[1],), jnp.float32) if weights is None
         else weights.astype(jnp.float32))
    wp = w[y]
    return jnp.sum(wp * nll) / jnp.sum(wp)


if __name__ == "__main__":
    key = jax.random.PRNGKey(0)
    k1, k2, k3 = jax.random.split(key, 3)

    N, C, H, W = 2, 4, 16, 16
    logits = jax.random.normal(k1, (N, C, H, W), jnp.float32)
    labels = jax.random.randint(k2, (N, H, W), 0, C, jnp.int32)
    weights = jax.random.uniform(k3, (C,), jnp.float32, 0.5, 2.0)

    # Weighted path (single block: images batched, full image per lane tile).
    loss_w = cross_entropy_loss_2d(logits, labels, weights)
    jax.block_until_ready(loss_w)
    ref_w = _reference(logits, labels, weights)
    assert jnp.allclose(loss_w, ref_w, atol=1e-5, rtol=1e-5), (loss_w, ref_w)

    # weights=None path (plain mean cross-entropy).
    loss_u = cross_entropy_loss_2d(logits, labels, None)
    jax.block_until_ready(loss_u)
    ref_u = _reference(logits, labels, None)
    assert jnp.allclose(loss_u, ref_u, atol=1e-5, rtol=1e-5), (loss_u, ref_u)

    # Ragged HW / multi-lane-tile path (exercises the lane mask).
    H2, W2 = 10, 20
    logits2 = jax.random.normal(k1, (N, C, H2, W2), jnp.float32)
    labels2 = jax.random.randint(k2, (N, H2, W2), 0, C, jnp.int32)
    loss_r = cross_entropy_loss_2d(logits2, labels2, weights, max_tile_hw=128)
    jax.block_until_ready(loss_r)
    ref_r = _reference(logits2, labels2, weights)
    assert jnp.allclose(loss_r, ref_r, atol=1e-5, rtol=1e-5), (loss_r, ref_r)

    # Ragged N / image-batched path (exercises the row mask + per-block partials).
    N3 = 3
    logits3 = jax.random.normal(k1, (N3, C, H, W), jnp.float32)
    labels3 = jax.random.randint(k2, (N3, H, W), 0, C, jnp.int32)
    loss_n = cross_entropy_loss_2d(logits3, labels3, weights, max_tile_n=2)
    jax.block_until_ready(loss_n)
    ref_n = _reference(logits3, labels3, weights)
    assert jnp.allclose(loss_n, ref_n, atol=1e-5, rtol=1e-5), (loss_n, ref_n)

    # bf16 logits pass straight through (kernel upcasts per tile).
    logits_bf = logits.astype(jnp.bfloat16)
    loss_b = cross_entropy_loss_2d(logits_bf, labels, weights)
    jax.block_until_ready(loss_b)
    ref_b = _reference(logits_bf, labels, weights)
    assert jnp.allclose(loss_b.astype(jnp.float32), ref_b, atol=2e-3, rtol=2e-3), (loss_b, ref_b)

    print("KERNEL_OK")
</pallas_src>

<mosaic_0001>
module attributes {stable_mosaic.version = 11 : i64} {
  func.func @_ce_kernel(%arg0: i32, %arg1: i32, %arg2: memref<2x4x256xf32, #tpu.memory_space<vmem>>, %arg3: memref<2x1x256xi16, #tpu.memory_space<vmem>>, %arg4: memref<1x4x1xf32, #tpu.memory_space<vmem>>, %arg5: memref<1x1xf32, #tpu.memory_space<vmem>>, %arg6: memref<1x1xf32, #tpu.memory_space<vmem>>, %arg7: memref<1x256xf32, #tpu.memory_space<vmem>>, %arg8: memref<1x256xf32, #tpu.memory_space<vmem>>) attributes {dimension_semantics = [#tpu.dimension_semantics<parallel>, #tpu.dimension_semantics<arbitrary>], iteration_bounds = array<i64: 1, 1>, scalar_prefetch = 0 : i64, scratch_operands = 2 : i64, tpu.core_type = #tpu.core_type<tc>, window_params = [{transform_indices = @transform_0, window_bounds = array<i64: 2, 4, 256>}, {transform_indices = @transform_1, window_bounds = array<i64: 2, 1, 256>}, {pipeline_mode = #tpu.pipeline_mode<synchronous>, transform_indices = @transform_2, window_bounds = array<i64: 1, 4, 1>}, {transform_indices = @transform_3, window_bounds = array<i64: 1, 1>}, {transform_indices = @transform_4, window_bounds = array<i64: 1, 1>}]} {
    %c0_i32 = arith.constant 0 : i32
    %0 = arith.cmpi eq, %arg1, %c0_i32 : i32
    %1 = arith.extui %0 : i1 to i32
    %c0_i32_0 = arith.constant 0 : i32
    %2 = arith.cmpi ne, %1, %c0_i32_0 : i32
    scf.if %2 {
      %cst_26 = arith.constant 0.000000e+00 : f32
      %42 = vector.broadcast %cst_26 : f32 to vector<1x256xf32>
      %c0_27 = arith.constant 0 : index
      %c0_28 = arith.constant 0 : index
      %43 = vector.load %arg7[%c0_27, %c0_28] : memref<1x256xf32, #tpu.memory_space<vmem>>, vector<1x256xf32>
      tpu.vector_store %arg7[%c0_27, %c0_28], %42 {strides = array<i32>} : memref<1x256xf32, #tpu.memory_space<vmem>>, vector<1x256xf32>,
      %cst_29 = arith.constant 0.000000e+00 : f32
      %44 = vector.broadcast %cst_29 : f32 to vector<1x256xf32>
      %c0_30 = arith.constant 0 : index
      %c0_31 = arith.constant 0 : index
      %45 = vector.load %arg8[%c0_30, %c0_31] : memref<1x256xf32, #tpu.memory_space<vmem>>, vector<1x256xf32>
      tpu.vector_store %arg8[%c0_30, %c0_31], %44 {strides = array<i32>} : memref<1x256xf32, #tpu.memory_space<vmem>>, vector<1x256xf32>,
    } else {
    }
    %c0 = arith.constant 0 : index
    %c0_1 = arith.constant 0 : index
    %c0_2 = arith.constant 0 : index
    %3 = vector.load %arg2[%c0, %c0_1, %c0_2] : memref<2x4x256xf32, #tpu.memory_space<vmem>>, vector<2x4x256xf32>
    %c0_3 = arith.constant 0 : index
    %c0_4 = arith.constant 0 : index
    %c0_5 = arith.constant 0 : index
    %4 = vector.load %arg3[%c0_3, %c0_4, %c0_5] : memref<2x1x256xi16, #tpu.memory_space<vmem>>, vector<2x1x256xi16>
    %5 = arith.extsi %4 : vector<2x1x256xi16> to vector<2x1x256xi32>
    %c0_6 = arith.constant 0 : index
    %c0_7 = arith.constant 0 : index
    %c0_8 = arith.constant 0 : index
    %6 = vector.load %arg4[%c0_6, %c0_7, %c0_8] : memref<1x4x1xf32, #tpu.memory_space<vmem>>, vector<1x4x1xf32>
    %cst = arith.constant dense<0xFF800000> : vector<2x256xf32>
    %7 = vector.multi_reduction <maximumf>, %3, %cst [1] : vector<2x4x256xf32> to vector<2x256xf32>
    %8 = vector.shape_cast %7 : vector<2x256xf32> to vector<2x1x256xf32>
    %9 = vector.broadcast %8 : vector<2x1x256xf32> to vector<2x4x256xf32>
    %10 = arith.subf %3, %9 : vector<2x4x256xf32>
    %11 = math.exp %10 : vector<2x4x256xf32>
    %cst_9 = arith.constant dense<0.000000e+00> : vector<2x256xf32>
    %12 = vector.multi_reduction <add>, %11, %cst_9 [1] : vector<2x4x256xf32> to vector<2x256xf32>
    %13 = vector.shape_cast %12 : vector<2x256xf32> to vector<2x1x256xf32>
    %14 = math.log %13 : vector<2x1x256xf32>
    %15 = arith.addf %8, %14 : vector<2x1x256xf32>
    %16 = tpu.iota {dimensions = array<i32: 1>} : vector<2x4x256xi32>
    %17 = vector.broadcast %5 : vector<2x1x256xi32> to vector<2x4x256xi32>
    %18 = arith.cmpi eq, %16, %17 : vector<2x4x256xi32>
    %cst_10 = arith.constant 0.000000e+00 : f32
    %19 = vector.broadcast %cst_10 : f32 to vector<2x4x256xf32>
    %20 = arith.select %18, %3, %19 : vector<2x4x256xi1>, vector<2x4x256xf32>
    %cst_11 = arith.constant dense<0.000000e+00> : vector<2x256xf32>
    %21 = vector.multi_reduction <add>, %20, %cst_11 [1] : vector<2x4x256xf32> to vector<2x256xf32>
    %22 = vector.shape_cast %21 : vector<2x256xf32> to vector<2x1x256xf32>
    %cst_12 = arith.constant 0.000000e+00 : f32
    %23 = vector.shape_cast %6 : vector<1x4x1xf32> to vector<1x4x1xf32>
    %24 = vector.broadcast %23 : vector<1x4x1xf32> to vector<2x4x256xf32>
    %25 = vector.broadcast %cst_12 : f32 to vector<2x4x256xf32>
    %26 = arith.select %18, %24, %25 : vector<2x4x256xi1>, vector<2x4x256xf32>
    %cst_13 = arith.constant dense<0.000000e+00> : vector<2x256xf32>
    %27 = vector.multi_reduction <add>, %26, %cst_13 [1] : vector<2x4x256xf32> to vector<2x256xf32>
    %28 = vector.shape_cast %27 : vector<2x256xf32> to vector<2x1x256xf32>
    %29 = arith.subf %15, %22 : vector<2x1x256xf32>
    %30 = arith.mulf %28, %29 : vector<2x1x256xf32>
    %c0_14 = arith.constant 0 : index
    %c0_15 = arith.constant 0 : index
    %31 = vector.load %arg7[%c0_14, %c0_15] : memref<1x256xf32, #tpu.memory_space<vmem>>, vector<1x256xf32>
    %cst_16 = arith.constant dense<0.000000e+00> : vector<1x256xf32>
    %32 = vector.multi_reduction <add>, %30, %cst_16 [0] : vector<2x1x256xf32> to vector<1x256xf32>
    %33 = arith.addf %31, %32 : vector<1x256xf32>
    %c0_17 = arith.constant 0 : index
    %c0_18 = arith.constant 0 : index
    %34 = vector.load %arg7[%c0_17, %c0_18] : memref<1x256xf32, #tpu.memory_space<vmem>>, vector<1x256xf32>
    tpu.vector_store %arg7[%c0_17, %c0_18], %33 {strides = array<i32>} : memref<1x256xf32, #tpu.memory_space<vmem>>, vector<1x256xf32>,
    %c0_19 = arith.constant 0 : index
    %c0_20 = arith.constant 0 : index
    %35 = vector.load %arg8[%c0_19, %c0_20] : memref<1x256xf32, #tpu.memory_space<vmem>>, vector<1x256xf32>
    %cst_21 = arith.constant dense<0.000000e+00> : vector<1x256xf32>
    %36 = vector.multi_reduction <add>, %28, %cst_21 [0] : vector<2x1x256xf32> to vector<1x256xf32>
    %37 = arith.addf %35, %36 : vector<1x256xf32>
    %c0_22 = arith.constant 0 : index
    %c0_23 = arith.constant 0 : index
    %38 = vector.load %arg8[%c0_22, %c0_23] : memref<1x256xf32, #tpu.memory_space<vmem>>, vector<1x256xf32>
    tpu.vector_store %arg8[%c0_22, %c0_23], %37 {strides = array<i32>} : memref<1x256xf32, #tpu.memory_space<vmem>>, vector<1x256xf32>,
    %c0_i32_24 = arith.constant 0 : i32
    %39 = arith.cmpi eq, %arg1, %c0_i32_24 : i32
    %40 = arith.extui %39 : i1 to i32
    %c0_i32_25 = arith.constant 0 : i32
    %41 = arith.cmpi ne, %40, %c0_i32_25 : i32
    scf.if %41 {
      %c0_26 = arith.constant 0 : index
      %c0_27 = arith.constant 0 : index
      %42 = vector.load %arg7[%c0_26, %c0_27] : memref<1x256xf32, #tpu.memory_space<vmem>>, vector<1x256xf32>
      %cst_28 = arith.constant dense<0.000000e+00> : vector<1xf32>
      %43 = vector.multi_reduction <add>, %42, %cst_28 [1] : vector<1x256xf32> to vector<1xf32>
      %44 = vector.shape_cast %43 : vector<1xf32> to vector<1x1xf32>
      %c0_29 = arith.constant 0 : index
      %c0_30 = arith.constant 0 : index
      %45 = vector.load %arg5[%c0_29, %c0_30] : memref<1x1xf32, #tpu.memory_space<vmem>>, vector<1x1xf32>
      tpu.vector_store %arg5[%c0_29, %c0_30], %44 {strides = array<i32>} : memref<1x1xf32, #tpu.memory_space<vmem>>, vector<1x1xf32>,
      %c0_31 = arith.constant 0 : index
      %c0_32 = arith.constant 0 : index
      %46 = vector.load %arg8[%c0_31, %c0_32] : memref<1x256xf32, #tpu.memory_space<vmem>>, vector<1x256xf32>
      %cst_33 = arith.constant dense<0.000000e+00> : vector<1xf32>
      %47 = vector.multi_reduction <add>, %46, %cst_33 [1] : vector<1x256xf32> to vector<1xf32>
      %48 = vector.shape_cast %47 : vector<1xf32> to vector<1x1xf32>
      %c0_34 = arith.constant 0 : index
      %c0_35 = arith.constant 0 : index
      %49 = vector.load %arg6[%c0_34, %c0_35] : memref<1x1xf32, #tpu.memory_space<vmem>>, vector<1x1xf32>
      tpu.vector_store %arg6[%c0_34, %c0_35], %48 {strides = array<i32>} : memref<1x1xf32, #tpu.memory_space<vmem>>, vector<1x1xf32>,
    } else {
    }
    return
  }
  func.func @transform_0(%arg0: i32, %arg1: i32) -> (i32, i32, i32) {
    %c0_i32 = arith.constant 0 : i32
    %c0_i32_0 = arith.constant 0 : i32
    return %arg0, %c0_i32, %arg1 : i32, i32, i32
  }
  func.func @transform_1(%arg0: i32, %arg1: i32) -> (i32, i32, i32) {
    %c0_i32 = arith.constant 0 : i32
    %c0_i32_0 = arith.constant 0 : i32
    return %arg0, %c0_i32, %arg1 : i32, i32, i32
  }
  func.func @transform_2(%arg0: i32, %arg1: i32) -> (i32, i32, i32) {
    %c0_i32 = arith.constant 0 : i32
    %c0_i32_0 = arith.constant 0 : i32
    %c0_i32_1 = arith.constant 0 : i32
    %c0_i32_2 = arith.constant 0 : i32
    return %c0_i32, %c0_i32_0, %c0_i32_1 : i32, i32, i32
  }
  func.func @transform_3(%arg0: i32, %arg1: i32) -> (i32, i32) {
    %c0_i32 = arith.constant 0 : i32
    %c0_i32_0 = arith.constant 0 : i32
    return %arg0, %c0_i32 : i32, i32
  }
  func.func @transform_4(%arg0: i32, %arg1: i32) -> (i32, i32) {
    %c0_i32 = arith.constant 0 : i32
    %c0_i32_0 = arith.constant 0 : i32
    return %arg0, %c0_i32 : i32, i32
  }
}

</mosaic_0001>

<bundles_post_ra>
// kernel: _ce_sums.1
= control target key start
LH: loop header
LB: loop body
LE: loop exit
PB: predicated region body
PF: predicated region fallthrough
CT: control target
= control target key end

     0   :  { %10 = vsyncpa [#allocation5], 0  ;;  %v22_v1 = vlaneseq  ;;  %v428_v2 = vmov 0   ;;  %s597_s0 = inlined_call_operand.vmem [shape: f32[2,4,256], index: 0, kind: input, shape index: {}]   ;;  %s598_s1 = inlined_call_operand.vmem [shape: s16[2,1,256], index: 1, kind: input, shape index: {}]   ;;  %s599_s2 = inlined_call_operand.vmem [shape: f32[1,4,1], index: 2, kind: input, shape index: {}]   ;;  %s600_s3 = inlined_call_operand.hbm [shape: f32[1,1], index: 3, kind: output, shape index: {0}]   ;;  %s601_s4 = inlined_call_operand.hbm [shape: f32[1,1], index: 4, kind: output, shape index: {1}]  }
   0x1   :  { %v34_v0 = vld [vmem:[%s599_s2] sm:$0xf]  ;;  %369 = vset.pattern.permute.xlu0 %v428_v2 }
   0x2   :  { %202 = vperm.xlu0 %369, %v34_v0   ;;  %vm461_vm0 = vcmp.lt.s32.totalorder %v22_v1, 256 }
   0x3   :  { %11 = vsyncpa [#allocation7], 0  ;;  %v429_v4 = vmov 0.0   ;;  %v472_v5 = vld [vmem:[%s597_s0] sm:$0xff]  ;;  %v477_v6 = vld [vmem:[%s597_s0 + $0x8] sm:$0xff]  ;;  %vm41_vm1 = vcmask 1043456  }
   0x4   :  { %26 = vst.msk [vmem:[#allocation2] sm:$0x3] %vm461_vm0, %v429_v4  ;;  %27 = vst.msk [vmem:[#allocation3] sm:$0x3] %vm461_vm0, %v429_v4  ;;  %v481_v7 = vcombine.high %v472_v5, %v472_v5  ;;  %v485_v8 = vcombine.high %v477_v6, %v477_v6  ;;  %v42_v9 = vsel %vm41_vm1, %v472_v5, -inf  ;;  %v56_v11 = vsel %vm41_vm1, %v477_v6, -inf }
   0x5   :  { %v43_v13 = vrot.slane %v42_v9, 4  ;;  %v57_v15 = vrot.slane %v56_v11, 4  ;;  %v513_v52 = vshrl.u32 %v22_v1, 7  ;;  %v30_v53 = vld [vmem:[%s598_s1] sm:$0x3]  ;;  %vm310_vm6 = vcmask 1040384  }
   0x6   :  { %v49_v10 = vsel %vm41_vm1, %v481_v7, -inf  ;;  %v63_v12 = vsel %vm41_vm1, %v485_v8, -inf  ;;  %v31_v55 = vld [vmem:[%s598_s1 + $0x2] sm:$0x3]  ;;  %v32_v58 = vunpack.c.l.b16 %v30_v53  ;;  %s431_s1 = smov [#allocation6]   ;;  %s432_s24 = smov [#allocation4]  }
   0x7   :  { %v50_v14 = vrot.slane %v49_v10, 4  ;;  %v64_v16 = vrot.slane %v63_v12, 4  ;;  %v44_v17 = vmax.f32 %v42_v9, %v43_v13  ;;  %v58_v19 = vmax.f32 %v56_v11, %v57_v15  ;;  %s352_s23 = sshll.u32 %s431_s1, 4  ;;  %s342_s25 = sshll.u32 %s432_s24, 4  ;;  %s353_s23 = int_to_ptr.vmem [resolvable:$true] %s352_s23  ;;  %s343_s25 = int_to_ptr.vmem [resolvable:$true] %s342_s25 }
   0x8   :  { %v522_v60 = vsub.s32 0, %v513_v52  ;;  %v33_v61 = vunpack.c.l.b16 %v31_v55  ;;  %v138_v63 = vsub.s32 2, %v513_v52  ;;  %vm316_vm7 = vcmask 0   ;;  %s384_s26 = scalar_lea.vmem %s353_s23, 16  ;;  %s388_s27 = scalar_lea.vmem %s353_s23, 32 }
   0x9   :  { %v51_v18 = vmax.f32 %v49_v10, %v50_v14  ;;  %v65_v20 = vmax.f32 %v63_v12, %v64_v16  ;;  %v45_v21 = vrot.slane %v44_v17, 2  ;;  %v59_v23 = vrot.slane %v58_v19, 2  ;;  %p385_p0 = scmp.ne.s32.totalorder %s353_s23, %s384_s26  ;;  %p389_p1 = scmp.lt.s32.totalorder %s353_s23, %s353_s23 }
   0xa   :  { %v135_v4 = vrot.slane %v32_v58, %v522_v60  ;;  %v139_v10 = vrot.slane %v32_v58, %v138_v63  ;;  %v143_v11 = vrot.slane %v33_v61, %v522_v60  ;;  %v147_v12 = vrot.slane %v33_v61, %v138_v63  ;;  %p390_p2 = scmp.lt.s32.totalorder %s388_s27, %s384_s26 }
   0xb   :  { %v52_v22 = vrot.slane %v51_v18, 2  ;;  %v66_v24 = vrot.slane %v65_v20, 2  ;;  %v46_v25 = vmax.f32 %v44_v17, %v45_v21  ;;  %v60_v27 = vmax.f32 %v58_v19, %v59_v23 }
   0xc   :  { %v151_v16 = vrot.slane %v135_v4, %v522_v60  ;;  %v159_v19 = vrot.slane %v143_v11, %v522_v60  ;;  %p391_p3 = por %p390_p2, %p389_p1 }
   0xd   :  { %v53_v26 = vmax.f32 %v51_v18, %v52_v22  ;;  %v67_v28 = vmax.f32 %v65_v20, %v66_v24  ;;  %v47_v29 = vrot.slane %v46_v25, 1  ;;  %v61_v31 = vrot.slane %v60_v27, 1 }
   0xe   :  { %v155_v18 = vrot.slane %v139_v10, %v522_v60  ;;  %v163_v20 = vrot.slane %v147_v12, %v522_v60  ;;  %vm532_vm2 = vcmp.eq.s32.totalorder %v513_v52, %v151_v16  ;;  %vm542_vm4 = vcmp.eq.s32.totalorder %v513_v52, %v159_v19  ;;  %p392_p4 = pnand %p391_p3, %p385_p0 }
   0xf   :  { %v54_v30 = vrot.slane %v53_v26, 1  ;;  %v68_v32 = vrot.slane %v67_v28, 1  ;;  %v495_v33 = vmax.f32 %v46_v25, %v47_v29  ;;  %v499_v35 = vmax.f32 %v60_v27, %v61_v31 }
  0x10   :  { %vm537_vm3 = vcmp.eq.s32.totalorder %v513_v52, %v155_v18  ;;  %vm547_vm5 = vcmp.eq.s32.totalorder %v513_v52, %v163_v20  ;;  %v168_v31 = vsel %vm532_vm2, %v472_v5, 0.0 }
  0x11   :  { %v497_v34 = vmax.f32 %v53_v26, %v54_v30  ;;  %v501_v36 = vmax.f32 %v67_v28, %v68_v32 }
  0x13   :  { %v74_v37 = vcombine.low %v495_v33, %v497_v34  ;;  %v75_v38 = vcombine.low %v499_v35, %v501_v36 }
  0x15   :  { %v78_v39 = vsub.f32 %v472_v5, %v74_v37  ;;  %v79_v40 = vsub.f32 %v477_v6, %v75_v38  ;;  %v169_v37 = vsel %vm537_vm3, %v481_v7, 0.0  ;;  %v170_v38 = vsel %vm542_vm4, %v477_v6, 0.0 }
  0x16   :  { %v179_v5 = vsel %vm41_vm1, %v169_v37, 0.0 }
  0x17   :  { %v80_v41 = vmul.f32 1.442695, %v78_v39  ;;  %v82_v42 = vmul.f32 1.442695, %v79_v40  ;;  %v171_v39 = vsel %vm547_vm5, %v485_v8, 0.0  ;;  %v180_v6 = vrot.slane %v179_v5, 4 }
  0x19   :  { %372 = vpow2.f32 %v80_v41 }
  0x1a   :  { %374 = vpow2.f32 %v82_v42  ;;  %v172_v42 = vsel %vm41_vm1, %v168_v31, 0.0 }
  0x1b   :  { %v173_v7 = vrot.slane %v172_v42, 4 }
  0x1d   :  { %v174_v8 = vadd.f32 %v173_v7, %v172_v42  ;;  %v430_v7 = vmov 1966171168  }
  0x26   :  { %v373_v43 = vpop.eup %372 }
  0x27   :  { %v375_v44 = vpop.eup %374  ;;  %v86_v45 = vcombine.high %v373_v43, %v373_v43  ;;  %v90_v47 = vsel %vm41_vm1, %v373_v43, 0.0 }
  0x28   :  { %v87_v46 = vcombine.high %v375_v44, %v375_v44  ;;  %v104_v48 = vsel %vm41_vm1, %v375_v44, 0.0  ;;  %v91_v50 = vrot.slane %v90_v47, 4  ;;  %v186_v44 = vsel %vm41_vm1, %v170_v38, 0.0 }
  0x29   :  { %v97_v49 = vsel %vm41_vm1, %v86_v45, 0.0  ;;  %v105_v54 = vrot.slane %v104_v48, 4  ;;  %v193_v45 = vsel %vm41_vm1, %v171_v39, 0.0 }
  0x2a   :  { %v111_v51 = vsel %vm41_vm1, %v87_v46, 0.0  ;;  %v98_v56 = vrot.slane %v97_v49, 4  ;;  %v92_v59 = vadd.f32 %v91_v50, %v90_v47  ;;  %v187_v46 = vrot.slane %v186_v44, 4 }
  0x2b   :  { %v112_v57 = vrot.slane %v111_v51, 4  ;;  %v106_v62 = vadd.f32 %v105_v54, %v104_v48  ;;  %v194_v47 = vrot.slane %v193_v45, 4  ;;  %v181_v48 = vadd.f32 %v180_v6, %v179_v5 }
  0x2c   :  { %v99_v0 = vadd.f32 %v98_v56, %v97_v49  ;;  %v93_v2 = vrot.slane %v92_v59, 2  ;;  %v188_v49 = vadd.f32 %v187_v46, %v186_v44  ;;  %v252_v6 = vunpack.c.l.s4 %v430_v7 }
  0x2d   :  { %v113_v1 = vadd.f32 %v112_v57, %v111_v51  ;;  %v107_v9 = vrot.slane %v106_v62, 2  ;;  %v195_v50 = vadd.f32 %v194_v47, %v193_v45  ;;  %v175_v51 = vrot.slane %v174_v8, 2 }
  0x2e   :  { %v100_v13 = vrot.slane %v99_v0, 2  ;;  %v94_v15 = vadd.f32 %v93_v2, %v92_v59  ;;  %v182_v53 = vrot.slane %v181_v48, 2  ;;  %v189_v54 = vrot.slane %v188_v49, 2 }
  0x2f   :  { %v114_v14 = vrot.slane %v113_v1, 2  ;;  %v108_v17 = vadd.f32 %v107_v9, %v106_v62  ;;  %v196_v55 = vrot.slane %v195_v50, 2  ;;  %v176_v57 = vadd.f32 %v175_v51, %v174_v8 }
  0x30   :  { %v101_v21 = vadd.f32 %v100_v13, %v99_v0  ;;  %v95_v23 = vrot.slane %v94_v15, 1  ;;  %v183_v59 = vadd.f32 %v182_v53, %v181_v48  ;;  %v190_v61 = vadd.f32 %v189_v54, %v188_v49 }
  0x31   :  { %v115_v22 = vadd.f32 %v114_v14, %v113_v1  ;;  %v109_v25 = vrot.slane %v108_v17, 1  ;;  %v197_v62 = vadd.f32 %v196_v55, %v195_v50  ;;  %v177_v1 = vrot.slane %v176_v57, 1 }
  0x32   :  { %v102_v29 = vrot.slane %v101_v21, 1  ;;  %v96_v32 = vadd.f32 %v95_v23, %v94_v15  ;;  %v184_v4 = vrot.slane %v183_v59, 1  ;;  %v191_v9 = vrot.slane %v190_v61, 1 }
  0x33   :  { %v116_v30 = vrot.slane %v115_v22, 1  ;;  %v110_v40 = vadd.f32 %v109_v25, %v108_v17  ;;  %v198_v10 = vrot.slane %v197_v62, 1  ;;  %v178_v26 = vadd.f32 %v177_v1, %v176_v57 }
  0x34   :  { %v103_v41 = vadd.f32 %v102_v29, %v101_v21  ;;  %376 = vlog2.f32 %v96_v32  ;;  %v192_v31 = vadd.f32 %v191_v9, %v190_v61  ;;  %v253_v55 = vunpack.c.0.s8 %v252_v6 }
  0x35   :  { %v117_v43 = vadd.f32 %v116_v30, %v115_v22  ;;  %378 = vlog2.f32 %v110_v40  ;;  %v185_v30 = vadd.f32 %v184_v4, %v183_v59  ;;  %v199_v27 = vadd.f32 %v198_v10, %v197_v62 }
  0x36   :  { %380 = vlog2.f32 %v103_v41 }
  0x37   :  { %382 = vlog2.f32 %v117_v43 }
  0x41   :  { %v377_v56 = vpop.eup %376 }
  0x42   :  { %v379_v58 = vpop.eup %378  ;;  %v119_v2 = vmul.f32 0.6931472, %v377_v56 }
  0x43   :  { %v381_v63 = vpop.eup %380  ;;  %v123_v13 = vmul.f32 0.6931472, %v379_v58 }
  0x44   :  { %v383_v0 = vpop.eup %382  ;;  %v121_v12 = vmul.f32 0.6931472, %v381_v63  ;;  %v126_v39 = vadd.f32 %v119_v2, %v495_v33 }
  0x45   :  { %v125_v14 = vmul.f32 0.6931472, %v383_v0  ;;  %v128_v41 = vadd.f32 %v123_v13, %v499_v35  ;;  %v256_v0 = vsub.s32 %v253_v55, %v513_v52 }
  0x46   :  { %v127_v40 = vadd.f32 %v121_v12, %v497_v34  ;;  %v237_v49 = vsub.f32 %v126_v39, %v178_v26 }
  0x47   :  { %v129_v42 = vadd.f32 %v125_v14, %v501_v36  ;;  %v239_v51 = vsub.f32 %v128_v41, %v192_v31  ;;  %v272_v14 = vld [vmem:[#allocation3] sm:$0x3] }
  0x48   :  { %v238_v50 = vsub.f32 %v127_v40, %v185_v30 }
  0x49   :  { %v240_v33 = vsub.f32 %v129_v42, %v199_v27 }
  0x7d   :  { %v203_v11 = vpop.permute.xlu0 %202 }
  0x7e   :  { %v205_v15 = vsel %vm532_vm2, %v203_v11, 0.0  ;;  %v206_v16 = vsel %vm537_vm3, %v203_v11, 0.0  ;;  %v207_v17 = vsel %vm542_vm4, %v203_v11, 0.0  ;;  %v208_v18 = vsel %vm547_vm5, %v203_v11, 0.0 }
  0x7f   :  { %v209_v19 = vsel %vm41_vm1, %v205_v15, 0.0  ;;  %v216_v20 = vsel %vm41_vm1, %v206_v16, 0.0  ;;  %v223_v21 = vsel %vm41_vm1, %v207_v17, 0.0  ;;  %v230_v22 = vsel %vm41_vm1, %v208_v18, 0.0  ;;  %v245_v15 = vld [vmem:[#allocation2] sm:$0x3] }
  0x80   :  { %v210_v23 = vrot.slane %v209_v19, 4  ;;  %v217_v24 = vrot.slane %v216_v20, 4  ;;  %v224_v25 = vrot.slane %v223_v21, 4  ;;  %v231_v29 = vrot.slane %v230_v22, 4 }
  0x82   :  { %v211_v32 = vadd.f32 %v210_v23, %v209_v19  ;;  %v218_v37 = vadd.f32 %v217_v24, %v216_v20  ;;  %v225_v28 = vadd.f32 %v224_v25, %v223_v21  ;;  %v232_v38 = vadd.f32 %v231_v29, %v230_v22 }
  0x83   :  { %v306_v20 = vsub.s32 1, %v513_v52 }
  0x84   :  { %v212_v43 = vrot.slane %v211_v32, 2  ;;  %v219_v5 = vrot.slane %v218_v37, 2  ;;  %v226_v44 = vrot.slane %v225_v28, 2  ;;  %v233_v45 = vrot.slane %v232_v38, 2 }
  0x86   :  { %v213_v46 = vadd.f32 %v212_v43, %v211_v32  ;;  %v220_v47 = vadd.f32 %v219_v5, %v218_v37  ;;  %v227_v8 = vadd.f32 %v226_v44, %v225_v28  ;;  %v234_v48 = vadd.f32 %v233_v45, %v232_v38 }
  0x88   :  { %v214_v53 = vrot.slane %v213_v46, 1  ;;  %v221_v34 = vrot.slane %v220_v47, 1  ;;  %v228_v54 = vrot.slane %v227_v8, 1  ;;  %v235_v35 = vrot.slane %v234_v48, 1 }
  0x8a   :  { %v215_v36 = vadd.f32 %v214_v53, %v213_v46  ;;  %v222_v56 = vadd.f32 %v221_v34, %v220_v47  ;;  %v229_v57 = vadd.f32 %v228_v54, %v227_v8  ;;  %v236_v58 = vadd.f32 %v235_v35, %v234_v48 }
  0x8c   :  { %v241_v59 = vmul.f32 %v237_v49, %v215_v36  ;;  %v242_v61 = vmul.f32 %v238_v50, %v222_v56  ;;  %v243_v62 = vmul.f32 %v239_v51, %v229_v57  ;;  %v244_v63 = vmul.f32 %v240_v33, %v236_v58 }
  0x8d   :  { %v273_v1 = vadd.f32 %v229_v57, %v215_v36  ;;  %v274_v2 = vadd.f32 %v236_v58, %v222_v56 }
  0x8e   :  { %v246_v4 = vadd.f32 %v243_v62, %v241_v59  ;;  %v247_v9 = vadd.f32 %v244_v63, %v242_v61 }
  0x8f   :  { %v277_v10 = vcombine.low %v273_v1, %v274_v2 }
  0x90   :  { %v250_v11 = vcombine.low %v246_v4, %v247_v9 }
  0x91   :  { %v284_v12 = vrot.slane %v277_v10, %v256_v0 }
  0x92   :  { %v257_v13 = vrot.slane %v250_v11, %v256_v0 }
  0x93   :  { %v291_v16 = vrot.slane %v284_v12, %v256_v0 }
  0x94   :  { %v264_v17 = vrot.slane %v257_v13, %v256_v0 }
  0x95   :  { %v293_v18 = vadd.f32 %v291_v16, %v272_v14 }
  0x96   :  { %v266_v19 = vadd.f32 %v264_v17, %v245_v15 }
  0x97   :  { %294 = vst.msk [vmem:[#allocation3] sm:$0x3] %vm461_vm0, %v293_v18 }
  0x98   :  { %271 = vst.msk [vmem:[#allocation2] sm:$0x3] %vm461_vm0, %v266_v19 }
  0x9e   :  { %v318_v21 = vld [vmem:[#allocation3] sm:$0x3] }
  0x9f   :  { %v323_v22 = vrot.slane %v318_v21, %v522_v60  ;;  %v327_v23 = vrot.slane %v318_v21, %v306_v20  ;;  %v298_v24 = vld [vmem:[#allocation2] sm:$0x3] }
  0xa0   :  { %v303_v25 = vrot.slane %v298_v24, %v522_v60  ;;  %v307_v29 = vrot.slane %v298_v24, %v306_v20 }
  0xa1   :  { %v330_v26 = vsel %vm310_vm6, %v323_v22, 0.0  ;;  %v331_v30 = vsel %vm310_vm6, %v327_v23, 0.0 }
  0xa2   :  { %v332_v31 = vadd.f32 %v331_v30, %v330_v26  ;;  %v311_v27 = vsel %vm310_vm6, %v303_v25, 0.0  ;;  %v312_v32 = vsel %vm310_vm6, %v307_v29, 0.0 }
  0xa3   :  { %v313_v37 = vadd.f32 %v312_v32, %v311_v27 }
  0xa4   :  { %333 = vadd.xlane.f32.xlu1 %v332_v31 }
  0xa5   :  { %314 = vadd.xlane.f32.xlu0 %v313_v37 }
 0x12d   :  { %v334_v3 = vpop.xlane.xlu1 %333 }
 0x12e   :  { %335 = vst.msk [vmem:[#allocation6] sm:$0x1] %vm316_vm7, %v334_v3  ;;  %v315_v52 = vpop.xlane.xlu0 %314 }
 0x12f   :  { %317 = vst.msk [vmem:[#allocation4] sm:$0x1] %vm316_vm7, %v315_v52 }
 0x130   :  { %395 = shalt.err (!%p392_p4)
}
 0x131   :  { %355 = dma.vmem_to_hbm [thread:$0]  %s353_s23, 16, %s601_s4, [#allocation7]  }
 0x132   :  { %s404_s30 = scalar_lea.vmem %s343_s25, 16  ;;  %s408_s5 = scalar_lea.vmem %s343_s25, 32 }
 0x133   :  { %p405_p5 = scmp.ne.s32.totalorder %s343_s25, %s404_s30  ;;  %p409_p6 = scmp.lt.s32.totalorder %s343_s25, %s343_s25 }
 0x134   :  { %p410_p7 = scmp.lt.s32.totalorder %s408_s5, %s404_s30 }
 0x136   :  { %p411_p8 = por %p410_p7, %p409_p6 }
 0x138   :  { %p412_p9 = pnand %p411_p8, %p405_p5 }
 0x13a   :  { %415 = shalt.err (!%p412_p9)
}
 0x13b   :  { %345 = dma.vmem_to_hbm [thread:$0]  %s343_s25, 16, %s600_s3, [#allocation5]  }
 0x13c   :  { %424 = dma.done.wait [#allocation5], 16  }
 0x13d   :  { %425 = vsyncadd [#allocation5], 4294967280 }
 0x13e   :  { %426 = dma.done.wait [#allocation7], 16  }
 0x13f   :  { %427 = vsyncadd [#allocation7], 4294967280 }
 0x140   :  { %362 = vsyncpa [#allocation5], 1 }
 0x141   :  { %363 = vsyncpa [#allocation7], 1 }

</bundles_post_ra>
